<compile_context>
chip_gen: v7x
topology: tpu7x:2x2x1
jax: 0.10.0
libtpu: 0.0.40
codegen_flags: <defaults>
</compile_context>

<pallas_src>
import numpy as np
import jax
import jax.numpy as jnp
from jax.experimental import pallas as pl
from jax.experimental.pallas import tpu as pltpu

EPS = 1e-5


# --------------------------------------------------------------------------
# Kernel: out = relu(x @ W1' + b1') @ W2' + b2'
# --------------------------------------------------------------------------
def mlp_kernel(x_ref, w1_ref, b1_ref, w2_ref, b2_ref, out_ref):
    h = jnp.dot(x_ref[...], w1_ref[...], preferred_element_type=jnp.float32)
    h = jnp.maximum(h + b1_ref[...], 0.0)                       # (TB, HL)
    out = jnp.dot(h, w2_ref[...], preferred_element_type=jnp.float32)
    out_ref[...] = (out + b2_ref[...]).astype(out_ref.dtype)    # (TB, OL)


# --------------------------------------------------------------------------
# Wrapper: constant-fold BN1 / BN2 / weight_norm into the two linear layers,
# then launch a batch-tiled pallas_call.
# --------------------------------------------------------------------------
def fold_params(p):
    # BN1 (eval): xn = x * scale1 + shift1
    scale1 = p["g1"] * jax.lax.rsqrt(p["v1"] + EPS)              # (1, IL)
    shift1 = p["b1"] - p["m1"] * scale1                          # (1, IL)
    # Fold into FC1:  xn @ w1t + bias1 = x @ W1f + b1f
    w1f = scale1.reshape(-1, 1) * p["w1t"]                       # (IL, HL)
    b1f = p["bias1"] + shift1 @ p["w1t"]                         # (1, HL)

    # weight_norm (dim=0): w2 = g * v / ||v||_row, rows over HL
    v = p["vw2"]                                                 # (OL, HL)
    row_norm = jnp.sqrt(jnp.sum(v * v, axis=1, keepdims=True))   # (OL, 1)
    w2 = (p["gw2"] / row_norm) * v                               # (OL, HL)
    w2t = w2.T                                                   # (HL, OL)

    # BN2 (eval): hn = h * scale2 + shift2, folded into FC2
    scale2 = p["g2"] * jax.lax.rsqrt(p["v2"] + EPS)              # (1, HL)
    shift2 = p["b2"] - p["m2"] * scale2                          # (1, HL)
    w2f = scale2.reshape(-1, 1) * w2t                            # (HL, OL)
    b2f = p["bias2"] + shift2 @ w2t                              # (1, OL)
    return w1f, b1f, w2f, b2f


def mlp_forward(x, params, tile_b=128):
    w1f, b1f, w2f, b2f = fold_params(params)
    B, IL = x.shape
    HL = w1f.shape[1]
    OL = w2f.shape[1]

    # Batch tile: full batch if small, else a multiple of 8.
    if B <= tile_b:
        tb = B
        Bp = B
    else:
        tb = max(8, (tile_b // 8) * 8)
        Bp = pl.cdiv(B, tb) * tb
        if Bp != B:
            x = jnp.pad(x, ((0, Bp - B), (0, 0)))

    grid = (Bp // tb,)
    out = pl.pallas_call(
        mlp_kernel,
        out_shape=jax.ShapeDtypeStruct((Bp, OL), jnp.float32),
        grid_spec=pltpu.PrefetchScalarGridSpec(
            num_scalar_prefetch=0,
            grid=grid,
            in_specs=[
                pl.BlockSpec((tb, IL), lambda i: (i, 0),
                             memory_space=pltpu.VMEM),
                pl.BlockSpec((IL, HL), lambda i: (0, 0),
                             memory_space=pltpu.VMEM),
                pl.BlockSpec((1, HL), lambda i: (0, 0),
                             memory_space=pltpu.VMEM),
                pl.BlockSpec((HL, OL), lambda i: (0, 0),
                             memory_space=pltpu.VMEM),
                pl.BlockSpec((1, OL), lambda i: (0, 0),
                             memory_space=pltpu.VMEM),
            ],
            out_specs=pl.BlockSpec((tb, OL), lambda i: (i, 0),
                                   memory_space=pltpu.VMEM),
        ),
        compiler_params=pltpu.CompilerParams(
            dimension_semantics=("parallel",),
            vmem_limit_bytes=64 << 20,
        ),
    )(x, w1f, b1f, w2f, b2f)

    if Bp != B:
        out = out[:B]
    return out


# --------------------------------------------------------------------------
# Deterministic parameter construction (matches PyTorch module structure)
# --------------------------------------------------------------------------
def make_params(key, IL, HL, OL):
    ks = jax.random.split(key, 8)
    f32 = jnp.float32
    w1 = jax.random.uniform(ks[0], (HL, IL), f32, -1.0, 1.0) / np.sqrt(IL)
    bias1 = jax.random.uniform(ks[1], (HL,), f32, -1.0, 1.0) / np.sqrt(IL)
    vw2 = jax.random.uniform(ks[2], (OL, HL), f32, -1.0, 1.0) / np.sqrt(HL)
    gw2 = 0.5 + jax.random.uniform(ks[3], (OL, 1), f32, 0.0, 1.0)
    bias2 = jax.random.uniform(ks[4], (OL,), f32, -1.0, 1.0) / np.sqrt(HL)
    g1 = 1.0 + 0.1 * jax.random.normal(ks[5], (IL,), f32)
    b1 = 0.1 * jax.random.normal(ks[6], (IL,), f32)
    m1 = 0.2 * jax.random.normal(ks[7], (IL,), f32)
    v1 = 0.5 + jnp.abs(0.3 * jax.random.normal(ks[5], (IL,), f32))
    g2 = 1.0 + 0.05 * jax.random.normal(ks[6], (HL,), f32)
    b2 = 0.05 * jax.random.normal(ks[7], (HL,), f32)
    m2 = 0.1 * jax.random.normal(ks[4], (HL,), f32)
    v2 = 0.75 + jnp.abs(0.2 * jax.random.normal(ks[3], (HL,), f32))

    r = lambda a: a.reshape(1, -1)
    return {
        "g1": r(g1), "b1": r(b1), "m1": r(m1), "v1": r(v1),
        "w1t": w1.T, "bias1": r(bias1),
        "g2": r(g2), "b2": r(b2), "m2": r(m2), "v2": r(v2),
        "vw2": vw2, "gw2": gw2, "bias2": r(bias2),
    }


def mlp_reference(x, p):
    xn = (x - p["m1"]) / jnp.sqrt(p["v1"] + EPS) * p["g1"] + p["b1"]
    h = jnp.maximum(xn @ p["w1t"] + p["bias1"], 0.0)
    hn = (h - p["m2"]) / jnp.sqrt(p["v2"] + EPS) * p["g2"] + p["b2"]
    v = p["vw2"]
    w2 = p["gw2"] * v / jnp.linalg.norm(v, axis=1, keepdims=True)
    return hn @ w2.T + p["bias2"]


if __name__ == "__main__":
    B, IL, HL, OL = 8, 32, 64, 8
    key = jax.random.PRNGKey(0)
    kx, kp = jax.random.split(key)
    x = jax.random.normal(kx, (B, IL), jnp.float32)
    params = make_params(kp, IL, HL, OL)

    out = mlp_forward(x, params)
    out = jax.block_until_ready(out)

    ref = mlp_reference(x, params)
    assert out.shape == (B, OL)
    np.testing.assert_allclose(np.asarray(out), np.asarray(ref), rtol=1e-5, atol=1e-5)
    print("KERNEL_OK")
</pallas_src>

<mosaic_0001>
module attributes {stable_mosaic.version = 11 : i64} {
  func.func @mlp_kernel(%arg0: i32, %arg1: memref<8x32xf32, #tpu.memory_space<vmem>>, %arg2: memref<32x64xf32, #tpu.memory_space<vmem>>, %arg3: memref<1x64xf32, #tpu.memory_space<vmem>>, %arg4: memref<64x8xf32, #tpu.memory_space<vmem>>, %arg5: memref<1x8xf32, #tpu.memory_space<vmem>>, %arg6: memref<8x8xf32, #tpu.memory_space<vmem>>) attributes {dimension_semantics = [#tpu.dimension_semantics<parallel>], iteration_bounds = array<i64: 1>, scalar_prefetch = 0 : i64, scratch_operands = 0 : i64, tpu.core_type = #tpu.core_type<tc>, window_params = [{transform_indices = @transform_0, window_bounds = array<i64: 8, 32>}, {pipeline_mode = #tpu.pipeline_mode<synchronous>, transform_indices = @transform_1, window_bounds = array<i64: 32, 64>}, {pipeline_mode = #tpu.pipeline_mode<synchronous>, transform_indices = @transform_2, window_bounds = array<i64: 1, 64>}, {pipeline_mode = #tpu.pipeline_mode<synchronous>, transform_indices = @transform_3, window_bounds = array<i64: 64, 8>}, {pipeline_mode = #tpu.pipeline_mode<synchronous>, transform_indices = @transform_4, window_bounds = array<i64: 1, 8>}, {transform_indices = @transform_5, window_bounds = array<i64: 8, 8>}]} {
    %c0 = arith.constant 0 : index
    %c0_0 = arith.constant 0 : index
    %0 = vector.load %arg1[%c0, %c0_0] : memref<8x32xf32, #tpu.memory_space<vmem>>, vector<8x32xf32>
    %c0_1 = arith.constant 0 : index
    %c0_2 = arith.constant 0 : index
    %1 = vector.load %arg2[%c0_1, %c0_2] : memref<32x64xf32, #tpu.memory_space<vmem>>, vector<32x64xf32>
    %cst = arith.constant dense<0.000000e+00> : vector<8x64xf32>
    %2 = tpu.matmul %0, %1, %cst {dimension_numbers = #tpu.dot_dimension_numbers<[1], [0], [0], [1], [0, 0, 1, 1], [], []>} : vector<8x32xf32>, vector<32x64xf32>, vector<8x64xf32> -> vector<8x64xf32>
    %c0_3 = arith.constant 0 : index
    %c0_4 = arith.constant 0 : index
    %3 = vector.load %arg3[%c0_3, %c0_4] : memref<1x64xf32, #tpu.memory_space<vmem>>, vector<1x64xf32>
    %4 = vector.broadcast %3 : vector<1x64xf32> to vector<8x64xf32>
    %5 = arith.addf %2, %4 : vector<8x64xf32>
    %cst_5 = arith.constant 0.000000e+00 : f32
    %6 = vector.broadcast %cst_5 : f32 to vector<8x64xf32>
    %7 = arith.maximumf %5, %6 : vector<8x64xf32>
    %c0_6 = arith.constant 0 : index
    %c0_7 = arith.constant 0 : index
    %8 = vector.load %arg4[%c0_6, %c0_7] : memref<64x8xf32, #tpu.memory_space<vmem>>, vector<64x8xf32>
    %cst_8 = arith.constant dense<0.000000e+00> : vector<8x8xf32>
    %9 = tpu.matmul %7, %8, %cst_8 {dimension_numbers = #tpu.dot_dimension_numbers<[1], [0], [0], [1], [0, 0, 1, 1], [], []>} : vector<8x64xf32>, vector<64x8xf32>, vector<8x8xf32> -> vector<8x8xf32>
    %c0_9 = arith.constant 0 : index
    %c0_10 = arith.constant 0 : index
    %10 = vector.load %arg5[%c0_9, %c0_10] : memref<1x8xf32, #tpu.memory_space<vmem>>, vector<1x8xf32>
    %11 = vector.broadcast %10 : vector<1x8xf32> to vector<8x8xf32>
    %12 = arith.addf %9, %11 : vector<8x8xf32>
    %c0_11 = arith.constant 0 : index
    %c0_12 = arith.constant 0 : index
    %13 = vector.load %arg6[%c0_11, %c0_12] : memref<8x8xf32, #tpu.memory_space<vmem>>, vector<8x8xf32>
    tpu.vector_store %arg6[%c0_11, %c0_12], %12 {strides = array<i32>} : memref<8x8xf32, #tpu.memory_space<vmem>>, vector<8x8xf32>,
    return
  }
  func.func @transform_0(%arg0: i32) -> (i32, i32) {
    %c0_i32 = arith.constant 0 : i32
    %c0_i32_0 = arith.constant 0 : i32
    return %arg0, %c0_i32 : i32, i32
  }
  func.func @transform_1(%arg0: i32) -> (i32, i32) {
    %c0_i32 = arith.constant 0 : i32
    %c0_i32_0 = arith.constant 0 : i32
    %c0_i32_1 = arith.constant 0 : i32
    return %c0_i32, %c0_i32_0 : i32, i32
  }
  func.func @transform_2(%arg0: i32) -> (i32, i32) {
    %c0_i32 = arith.constant 0 : i32
    %c0_i32_0 = arith.constant 0 : i32
    %c0_i32_1 = arith.constant 0 : i32
    return %c0_i32, %c0_i32_0 : i32, i32
  }
  func.func @transform_3(%arg0: i32) -> (i32, i32) {
    %c0_i32 = arith.constant 0 : i32
    %c0_i32_0 = arith.constant 0 : i32
    %c0_i32_1 = arith.constant 0 : i32
    return %c0_i32, %c0_i32_0 : i32, i32
  }
  func.func @transform_4(%arg0: i32) -> (i32, i32) {
    %c0_i32 = arith.constant 0 : i32
    %c0_i32_0 = arith.constant 0 : i32
    %c0_i32_1 = arith.constant 0 : i32
    return %c0_i32, %c0_i32_0 : i32, i32
  }
  func.func @transform_5(%arg0: i32) -> (i32, i32) {
    %c0_i32 = arith.constant 0 : i32
    %c0_i32_0 = arith.constant 0 : i32
    return %arg0, %c0_i32 : i32, i32
  }
}

</mosaic_0001>

<bundles_post_ra>
// kernel: tpu_custom_call.1
= control target key start
LH: loop header
LB: loop body
LE: loop exit
PB: predicated region body
PF: predicated region fallthrough
CT: control target
= control target key end

     0   :  { %10 = vsyncpa [#allocation3], 0  ;;  %s608_s0 = inlined_call_operand.hbm [shape: f32[8,32], index: 0, kind: input, shape index: {}]   ;;  %s609_s1 = inlined_call_operand.hbm [shape: f32[32,64], index: 1, kind: input, shape index: {}]   ;;  %s610_s2 = inlined_call_operand.hbm [shape: f32[1,64], index: 2, kind: input, shape index: {}]   ;;  %s611_s3 = inlined_call_operand.hbm [shape: f32[64,8], index: 3, kind: input, shape index: {}]   ;;  %s612_s4 = inlined_call_operand.hbm [shape: f32[1,8], index: 4, kind: input, shape index: {}]   ;;  %s613_s5 = inlined_call_operand.hbm [shape: f32[8,8], index: 5, kind: output, shape index: {}]  }
   0x1   :  { %11 = vsyncpa [#allocation6], 0 }
   0x2   :  { %12 = vsyncpa [#allocation9], 0 }
   0x3   :  { %13 = vsyncpa [#allocation4], 0  ;;  %s495_s18 = smov [#allocation5]   ;;  %s355_s22 = scalar_lea.hbm %s609_s1, 512 }
   0x4   :  { %s29_s19 = sshll.u32 %s495_s18, 4  ;;  %p356_p0 = scmp.ne.s32.totalorder %s609_s1, %s355_s22  ;;  %s30_s19 = int_to_ptr.vmem [resolvable:$true] %s29_s19 }
   0x5   :  { %p359_p1 = scmp.lt.u32.totalorder %s355_s22, %s609_s1 }
   0x7   :  { %p361_p2 = pnand %p359_p1, %p356_p0 }
   0x9   :  { %364 = shalt.err (!%p361_p2)
}
   0xa   :  { %s365_s27 = scalar_lea.vmem %s30_s19, 512  ;;  %p370_p4 = scmp.lt.s32.totalorder %s30_s19, %s30_s19 }
   0xb   :  { %p366_p3 = scmp.ne.s32.totalorder %s30_s19, %s365_s27  ;;  %p371_p5 = scmp.lt.s32.totalorder %s365_s27, %s365_s27 }
   0xd   :  { %p372_p6 = por %p371_p5, %p370_p4 }
   0xf   :  { %p373_p7 = pnand %p372_p6, %p366_p3 }
  0x11   :  { %376 = shalt.err (!%p373_p7)
}
  0x12   :  { %s496_s28 = smov 128   ;;  %s497_s29 = smov 8  }
  0x13   :  { %35 = dma.hbm_to_vmem [thread:$0]  %s609_s1, 512, %s30_s19, [#allocation6], %s496_s28, %s496_s28, %s497_s29  }
  0x14   :  { %s498_s7 = smov [#allocation8]   ;;  %s499_s9 = smov [#allocation2]  }
  0x15   :  { %s51_s8 = sshll.u32 %s498_s7, 4  ;;  %s20_s10 = sshll.u32 %s499_s9, 4  ;;  %s52_s8 = int_to_ptr.vmem [resolvable:$true] %s51_s8  ;;  %s21_s10 = int_to_ptr.vmem [resolvable:$true] %s20_s10 }
  0x16   :  { %s377_s13 = scalar_lea.hbm %s611_s3, 1024 }
  0x17   :  { %p378_p8 = scmp.ne.s32.totalorder %s611_s3, %s377_s13  ;;  %p381_p9 = scmp.lt.u32.totalorder %s377_s13, %s611_s3 }
  0x19   :  { %p383_p10 = pnand %p381_p9, %p378_p8 }
  0x1b   :  { %386 = shalt.err (!%p383_p10)
}
  0x1c   :  { %s387_s1 = scalar_lea.vmem %s52_s8, 1024  ;;  %p392_p12 = scmp.lt.s32.totalorder %s52_s8, %s52_s8 }
  0x1d   :  { %p388_p11 = scmp.ne.s32.totalorder %s52_s8, %s387_s1  ;;  %p393_p13 = scmp.lt.s32.totalorder %s387_s1, %s387_s1 }
  0x1f   :  { %p394_p0 = por %p393_p13, %p392_p12 }
  0x21   :  { %p395_p1 = pnand %p394_p0, %p388_p11 }
  0x23   :  { %398 = shalt.err (!%p395_p1)
}
  0x24   :  { %57 = dma.hbm_to_vmem [thread:$0]  %s611_s3, 1024, %s52_s8, [#allocation9], %s496_s28, %s496_s28, %s497_s29  }
  0x25   :  { %s399_s22 = scalar_lea.hbm %s608_s0, 128 }
  0x26   :  { %p400_p2 = scmp.ne.s32.totalorder %s608_s0, %s399_s22  ;;  %p403_p3 = scmp.lt.u32.totalorder %s399_s22, %s608_s0 }
  0x28   :  { %p405_p4 = pnand %p403_p3, %p400_p2 }
  0x2a   :  { %408 = shalt.err (!%p405_p4)
}
  0x2b   :  { %s409_s27 = scalar_lea.vmem %s21_s10, 128  ;;  %p414_p6 = scmp.lt.s32.totalorder %s21_s10, %s21_s10 }
  0x2c   :  { %p410_p5 = scmp.ne.s32.totalorder %s21_s10, %s409_s27  ;;  %p415_p7 = scmp.lt.s32.totalorder %s409_s27, %s409_s27 }
  0x2e   :  { %p416_p8 = por %p415_p7, %p414_p6 }
  0x30   :  { %p417_p9 = pnand %p416_p8, %p410_p5 }
  0x32   :  { %420 = shalt.err (!%p417_p9)
}
  0x33   :  { %23 = dma.hbm_to_vmem [thread:$0]  %s608_s0, 128, %s21_s10, [#allocation3]  }
  0x34   :  { %s500_s29 = smov [#allocation7]   ;;  %s501_s6 = smov [#allocation10]  }
  0x35   :  { %s42_s30 = sshll.u32 %s500_s29, 4  ;;  %s64_s7 = sshll.u32 %s501_s6, 4  ;;  %s43_s30 = int_to_ptr.vmem [resolvable:$true] %s42_s30  ;;  %s65_s7 = int_to_ptr.vmem [resolvable:$true] %s64_s7 }
  0x36   :  { %s421_s11 = scalar_lea.hbm %s610_s2, 16 }
  0x37   :  { %p422_p10 = scmp.ne.s32.totalorder %s610_s2, %s421_s11  ;;  %p425_p11 = scmp.lt.u32.totalorder %s421_s11, %s610_s2 }
  0x39   :  { %p427_p12 = pnand %p425_p11, %p422_p10 }
  0x3b   :  { %430 = shalt.err (!%p427_p12)
}
  0x3c   :  { %s431_s0 = scalar_lea.vmem %s43_s30, 16  ;;  %s435_s10 = scalar_lea.vmem %s43_s30, 32 }
  0x3d   :  { %p432_p13 = scmp.ne.s32.totalorder %s43_s30, %s431_s0  ;;  %p436_p0 = scmp.lt.s32.totalorder %s43_s30, %s43_s30 }
  0x3e   :  { %p437_p1 = scmp.lt.s32.totalorder %s435_s10, %s431_s0 }
  0x40   :  { %p438_p2 = por %p437_p1, %p436_p0 }
  0x42   :  { %p439_p3 = pnand %p438_p2, %p432_p13 }
  0x44   :  { %442 = shalt.err (!%p439_p3)
}
  0x45   :  { %45 = dma.hbm_to_vmem [thread:$0]  %s610_s2, 16, %s43_s30, [#allocation6]  }
  0x46   :  { %s443_s19 = scalar_lea.hbm %s612_s4, 16 }
  0x47   :  { %p444_p4 = scmp.ne.s32.totalorder %s612_s4, %s443_s19  ;;  %p447_p5 = scmp.lt.u32.totalorder %s443_s19, %s612_s4 }
  0x49   :  { %p449_p6 = pnand %p447_p5, %p444_p4 }
  0x4b   :  { %452 = shalt.err (!%p449_p6)
}
  0x4c   :  { %s453_s24 = scalar_lea.vmem %s65_s7, 16  ;;  %s457_s25 = scalar_lea.vmem %s65_s7, 32 }
  0x4d   :  { %p454_p7 = scmp.ne.s32.totalorder %s65_s7, %s453_s24  ;;  %p458_p8 = scmp.lt.s32.totalorder %s65_s7, %s65_s7 }
  0x4e   :  { %p459_p9 = scmp.lt.s32.totalorder %s457_s25, %s453_s24 }
  0x50   :  { %p460_p10 = por %p459_p9, %p458_p8 }
  0x52   :  { %p461_p11 = pnand %p460_p10, %p454_p7 }
  0x54   :  { %464 = shalt.err (!%p461_p11)
}
  0x55   :  { %67 = dma.hbm_to_vmem [thread:$0]  %s612_s4, 16, %s65_s7, [#allocation9]  }
  0x56   :  { %487 = dma.done.wait [#allocation3], 128  }
  0x57   :  { %488 = vsyncadd [#allocation3], 4294967168 }
  0x58   :  { %489 = dma.done.wait [#allocation6], 528  }
  0x59   :  { %490 = vsyncadd [#allocation6], 4294966768 }
  0x5a   :  { %491 = dma.done.wait [#allocation9], 1040  }
  0x5b   :  { %492 = vsyncadd [#allocation9], 4294966256  ;;  %v502_v0 = vmov 0.0|0.0   ;;  %vm503_vm0 = vmmov 0   ;;  %v504_v1 = vmov 0.0   ;;  %v84_v2 = vld [vmem:[#allocation5] sm:$0xff] }
  0x5c   :  { %326 = vmatprep.subr.bf16.mxu0 %v502_v0  ;;  %304 = vmatprep.mubr.msk.f32.mxu0 %vm503_vm0, %v504_v1  ;;  %v85_v3 = vld [vmem:[#allocation5 + $0x8] sm:$0xff]  ;;  %v86_v4 = vld [vmem:[#allocation5 + $0x10] sm:$0xff]  ;;  %v87_v6 = vld [vmem:[#allocation5 + $0x18] sm:$0xff]  ;;  %vm95_vm1 = vcmask 261120   ;;  %vm185_vm2 = vcmask 523264   ;;  %s505_s4 = smov [#allocation11]  }
  0x5d   :  { %332 = vmatprep.subr.bf16.mxu1 %v502_v0  ;;  %323 = vmatprep.mubr.msk.f32.mxu1 %vm503_vm0, %v504_v1  ;;  %v327_v5 = vpack.c.bf16 %v85_v3, %v84_v2  ;;  %v170_v7 = vld [vmem:[#allocation8] sm:$0xff]  ;;  %v171_v8 = vld [vmem:[#allocation8 + $0x8] sm:$0xff]  ;;  %v172_v9 = vld [vmem:[#allocation8 + $0x10] sm:$0xff]  ;;  %v330_v11 = vpack.c.bf16 %v87_v6, %v86_v4  ;;  %s267_s27 = sshll.u32 %s505_s4, 4  ;;  %vm259_vm3 = vcmask 64512   ;;  %s268_s27 = int_to_ptr.vmem [resolvable:$true] %s267_s27 }
  0x5e   :  { %v173_v10 = vld [vmem:[#allocation8 + $0x18] sm:$0xff]  ;;  %v333_v12 = vpack.c.bf16 %v171_v8, %v170_v7  ;;  %v174_v14 = vld [vmem:[#allocation8 + $0x20] sm:$0xff]  ;;  %v175_v15 = vld [vmem:[#allocation8 + $0x28] sm:$0xff]  ;;  %s465_s3 = scalar_lea.vmem %s268_s27, 128  ;;  %p470_p13 = scmp.lt.s32.totalorder %s268_s27, %s268_s27 }
  0x5f   :  { %328 = vmatpush3.bf16.msra.mxu0 %v327_v5  ;;  %v336_v13 = vpack.c.bf16 %v173_v10, %v172_v9  ;;  %v83_v16 = vld [vmem:[#allocation2] sm:$0xff]  ;;  %v339_v17 = vpack.c.bf16 %v175_v15, %v174_v14  ;;  %v278_v21 = vld [vmem:[#allocation7] ss:$0 sm:$0xff]  ;;  %v280_v26 = vld [vmem:[#allocation10] ss:$0 sm:$0xff]  ;;  %p466_p12 = scmp.ne.s32.totalorder %s268_s27, %s465_s3  ;;  %p471_p0 = scmp.lt.s32.totalorder %s465_s3, %s465_s3 }
  0x60   :  { %329 = vmatprep.subr.bf16.mxu0 %v502_v0  ;;  %334 = vmatpush3.bf16.msra.mxu1 %v333_v12  ;;  %v176_v18 = vld [vmem:[#allocation8 + $0x30] sm:$0xff]  ;;  %v177_v19 = vld [vmem:[#allocation8 + $0x38] sm:$0xff] }
  0x61   :  { %335 = vmatprep.subr.bf16.mxu1 %v502_v0  ;;  %v342_v20 = vpack.c.bf16 %v177_v19, %v176_v18  ;;  %p472_p1 = por %p471_p0, %p470_p13 }
  0x63   :  { %331 = vmatpush3.bf16.msra.mxu0 %v330_v11  ;;  %p473_p2 = pnand %p472_p1, %p466_p12 }
  0x64   :  { %337 = vmatpush3.bf16.msra.mxu1 %v336_v13 }
  0x65   :  { %338 = vmatprep.subr.bf16.mxu1 %v502_v0 }
  0x66   :  { %305 = vmatmul.mubr.msk.f32.vlgmr.msra.gmra.mrb[0].mxu0 %vm95_vm1, %v83_v16 }
  0x68   :  { %340 = vmatpush3.bf16.msra.mxu1 %v339_v17 }
  0x69   :  { %341 = vmatprep.subr.bf16.mxu1 %v502_v0 }
  0x6c   :  { %343 = vmatpush3.bf16.msra.mxu1 %v342_v20 }
 0x139   :  { %v165_v22 = vpop.f32.mrb[0].mxu0 }
 0x13a   :  { %v166_v23 = vadd.f32 %v278_v21, %v165_v22  ;;  %v306_v24 = vpop.f32.mrb[1].mxu0 }
 0x13c   :  { %v169_v25 = vmax.f32 %v166_v23, 0.0 }
 0x13e   :  { %324 = vmatmul.mubr.msk.f32.vlgmr.msra.gmra.mrb[0].mxu1 %vm185_vm2, %v169_v25 }
 0x211   :  { %v255_v27 = vpop.f32.mrb[0].mxu1 }
 0x212   :  { %v256_v28 = vadd.f32 %v280_v26, %v255_v27  ;;  %v325_v29 = vpop.f32.mrb[1].mxu1 }
 0x214   :  { %260 = vst.msk [vmem:[#allocation11] sm:$0xff] %vm259_vm3, %v256_v28 }
 0x215   :  { %476 = shalt.err (!%p473_p2)
}
 0x216   :  { %s477_s30 = scalar_lea.hbm %s613_s5, 128 }
 0x217   :  { %p478_p3 = scmp.ne.s32.totalorder %s613_s5, %s477_s30  ;;  %p481_p4 = scmp.lt.u32.totalorder %s477_s30, %s613_s5 }
 0x219   :  { %p483_p5 = pnand %p481_p4, %p478_p3 }
 0x21b   :  { %486 = shalt.err (!%p483_p5)
}
 0x21c   :  { %270 = dma.vmem_to_hbm [thread:$0]  %s268_s27, 128, %s613_s5, [#allocation4]  }
 0x21d   :  { %493 = dma.done.wait [#allocation4], 128  }
 0x21e   :  { %494 = vsyncadd [#allocation4], 4294967168 }
 0x21f   :  { %274 = vsyncpa [#allocation3], 1 }
 0x220   :  { %275 = vsyncpa [#allocation6], 1 }
 0x221   :  { %276 = vsyncpa [#allocation9], 1 }
 0x222   :  { %277 = vsyncpa [#allocation4], 1 }

</bundles_post_ra>
